<compile_context>
chip_gen: v7x
topology: tpu7x:2x2x1
jax: 0.10.0
libtpu: 0.0.40
codegen_flags: <defaults>
</compile_context>

<pallas_src>
from functools import partial

import jax
import jax.numpy as jnp
from jax.experimental import pallas as pl
from jax.experimental.pallas import tpu as pltpu


def _integrated_kernel(num_heads,
                       tok_ref, act_ref,
                       w_tok_ref, b_tok_ref, w_aq_ref, b_aq_ref,
                       w_kv_ref, b_kv_ref, wo_ref, bo_ref,
                       w1_ref, b1_ref, w2_ref, b2_ref,
                       out_ref):
    f32 = jnp.float32
    B = act_ref.shape[0]                      # (B, 1, A)
    BN, C = tok_ref.shape                     # (B*N, C)
    N = BN // B
    A = act_ref.shape[2]
    E = w_kv_ref.shape[0]
    D = w2_ref.shape[1]
    H = num_heads
    d = E // H
    scale = 1.0 / float(d) ** 0.5

    tok = tok_ref[...]                        # (B*N, C)
    act = act_ref[...]                        # (B, 1, A)

    # --- token embedding: tiny-K (C) contraction on the VPU (broadcast MACs) ---
    tok_e = b_tok_ref[...]                    # (1, E) -> broadcasts to (B*N, E)
    for c in range(C):
        tok_e = tok_e + tok[:, c:c + 1] * w_tok_ref[c:c + 1, :]        # (B*N, E)

    # --- action -> query (W_act and W_q folded into one affine map), VPU MACs ---
    q3 = b_aq_ref[...]                        # (1, E) -> broadcasts to (B, 1, E)
    for a in range(A):
        q3 = q3 + act[:, :, a:a + 1] * w_aq_ref[a:a + 1, :]            # (B, 1, E)

    # --- fused K|V projection: one MXU matmul for the whole batch ---
    kv = jnp.dot(tok_e, w_kv_ref[...], preferred_element_type=f32) + b_kv_ref[...]  # (B*N, 2E)
    kv3 = kv.reshape(B, N, 2 * E)
    k3 = kv3[:, :, :E]                        # (B, N, E)
    v3 = kv3[:, :, E:]                        # (B, N, E)

    # --- static head-selection mask: m_head[h, e] = 1 iff lane e belongs to head h ---
    e_ids = jax.lax.broadcasted_iota(jnp.int32, (H, E), 1)
    h_ids = jax.lax.broadcasted_iota(jnp.int32, (H, E), 0)
    lower = h_ids * d
    m_head = jnp.where((e_ids >= lower) & (e_ids < lower + d), 1.0, 0.0).astype(f32)  # (H, E)

    # --- all-head scores in one batched matmul: (B,H,E) x (B,N,E) -> (B,H,N) ---
    qmask = q3 * m_head[None, :, :]                                    # (B, H, E)
    scores = jnp.einsum('bhe,bne->bhn', qmask, k3,
                        preferred_element_type=f32) * scale            # (B, H, N)

    # --- softmax over keys (lane axis); reciprocal on the EUP ---
    m = jnp.max(scores, axis=-1, keepdims=True)
    p = jnp.exp(scores - m)
    denom = jnp.sum(p, axis=-1, keepdims=True)
    p = p * pl.reciprocal(denom, approx=True)                          # (B, H, N)

    attn_avg = jnp.sum(p, axis=1) * (1.0 / float(H))                   # (B, N), head-averaged

    # --- per-head context, then collapse heads back onto the E lanes ---
    ctx = jnp.einsum('bhn,bne->bhe', p, v3, preferred_element_type=f32)  # (B, H, E)
    attn_out = jnp.sum(ctx * m_head[None, :, :], axis=1)               # (B, E)

    feats = jnp.dot(attn_out, wo_ref[...], preferred_element_type=f32) + bo_ref[...]   # (B, E)

    # --- PredictionModule: 2-layer MLP ---
    h1 = jnp.maximum(jnp.dot(feats, w1_ref[...], preferred_element_type=f32)
                     + b1_ref[...], 0.0)                               # (B, hidden)
    pred = jnp.dot(h1, w2_ref[...], preferred_element_type=f32) + b2_ref[...]           # (B, D)

    # --- lane-dense packed output slab: [ pred | attn_avg | zero pad ] -> (B, OW) ---
    OW = out_ref.shape[1]
    out_ref[:, 0:D] = pred
    out_ref[:, D:D + N] = attn_avg
    if OW > D + N:
        out_ref[:, D + N:OW] = jnp.zeros((B, OW - D - N), f32)


def init_params(key, c, a, embed_dim, hidden_dim, delta_dim):
    ks = jax.random.split(key, 9)

    def lin(k, fan_in, fan_out):
        scale = 1.0 / (fan_in ** 0.5)
        return jax.random.uniform(k, (fan_in, fan_out), jnp.float32, -scale, scale)

    E = embed_dim
    return {
        "w_tok": lin(ks[0], c, E), "b_tok": jnp.zeros((1, E), jnp.float32),
        "w_act": lin(ks[1], a, E), "b_act": jnp.zeros((1, E), jnp.float32),
        "wq": lin(ks[2], E, E), "bq": jnp.zeros((1, E), jnp.float32),
        "wk": lin(ks[3], E, E), "bk": jnp.zeros((1, E), jnp.float32),
        "wv": lin(ks[4], E, E), "bv": jnp.zeros((1, E), jnp.float32),
        "wo": lin(ks[5], E, E), "bo": jnp.zeros((1, E), jnp.float32),
        "w1": lin(ks[6], E, hidden_dim), "b1": jnp.zeros((1, hidden_dim), jnp.float32),
        "w2": lin(ks[7], hidden_dim, delta_dim), "b2": jnp.zeros((1, delta_dim), jnp.float32),
    }


def integrated_forward(state, action, params, num_heads, delta_shape):
    B, Hg, Wg, C = state.shape
    N = Hg * Wg
    A = action.shape[-1]
    E = params["w_tok"].shape[1]
    D = params["w2"].shape[1]
    assert E % num_heads == 0

    tokens = state.reshape(B * N, C).astype(jnp.float32)     # (B*N, C)
    act3 = action.reshape(B, 1, A).astype(jnp.float32)       # (B, 1, A)

    # Exact algebraic folds done once in the wrapper (plain XLA ops).
    w_aq = params["w_act"] @ params["wq"]                                  # (A, E)
    b_aq = params["b_act"] @ params["wq"] + params["bq"]                   # (1, E)
    w_kv = jnp.concatenate([params["wk"], params["wv"]], axis=1)           # (E, 2E)
    b_kv = jnp.concatenate([params["bk"], params["bv"]], axis=1)           # (1, 2E)

    OW = ((D + N + 127) // 128) * 128                                      # lane-dense slab width

    weights = [params["w_tok"], params["b_tok"], w_aq, b_aq, w_kv, b_kv,
               params["wo"], params["bo"], params["w1"], params["b1"],
               params["w2"], params["b2"]]

    def full_spec(arr):
        nd = arr.ndim
        return pl.BlockSpec(arr.shape, lambda i, _nd=nd: (0,) * _nd)

    in_specs = [full_spec(tokens), full_spec(act3)] + [full_spec(w) for w in weights]
    out_specs = pl.BlockSpec((B, OW), lambda i: (0, 0))
    out_shape = jax.ShapeDtypeStruct((B, OW), jnp.float32)

    packed = pl.pallas_call(
        partial(_integrated_kernel, num_heads),
        out_shape=out_shape,
        grid_spec=pltpu.PrefetchScalarGridSpec(
            num_scalar_prefetch=0,
            grid=(1,),
            in_specs=in_specs,
            out_specs=out_specs,
        ),
        compiler_params=pltpu.CompilerParams(dimension_semantics=("arbitrary",)),
    )(tokens, act3, *weights)

    next_state_pred = packed[:, :D].reshape((B,) + tuple(delta_shape))
    attention_weight = packed[:, D:D + N].reshape(B, 1, N)   # nn.MultiheadAttention avg weights
    return next_state_pred, attention_weight


def _reference_forward(state, action, params, num_heads, delta_shape):
    """Pure-JAX reference matching the original module semantics."""
    B, Hg, Wg, C = state.shape
    N = Hg * Wg
    E = params["w_tok"].shape[1]
    d = E // num_heads
    tok = state.reshape(B, N, C).astype(jnp.float32)
    tok_e = tok @ params["w_tok"] + params["b_tok"]                        # (B, N, E)
    q_in = action.astype(jnp.float32) @ params["w_act"] + params["b_act"]  # (B, E)
    Q = q_in @ params["wq"] + params["bq"]
    K = tok_e @ params["wk"] + params["bk"]
    V = tok_e @ params["wv"] + params["bv"]
    Qh = Q.reshape(B, num_heads, d)
    Kh = K.reshape(B, N, num_heads, d)
    Vh = V.reshape(B, N, num_heads, d)
    s = jnp.einsum('bhd,bnhd->bhn', Qh, Kh) / jnp.sqrt(float(d))
    p = jax.nn.softmax(s, axis=-1)                                         # (B, H, N)
    ctx = jnp.einsum('bhn,bnhd->bhd', p, Vh).reshape(B, E)
    feats = ctx @ params["wo"] + params["bo"]
    h1 = jax.nn.relu(feats @ params["w1"] + params["b1"])
    pred = h1 @ params["w2"] + params["b2"]
    return pred.reshape((B,) + tuple(delta_shape)), p.mean(axis=1).reshape(B, 1, N)


if __name__ == "__main__":
    # Small shapes consistent with the module:
    #   batch=2, grid 4x4 with 3 channels, 4 discrete actions (one-hot),
    #   embed_dim=32, num_heads=4, delta_shape=(4,4,3), MLP hidden=64.
    B, Hg, Wg, C = 2, 4, 4, 3
    A = 4
    embed_dim, num_heads = 32, 4
    delta_shape = (4, 4, 3)
    hidden_dim = 64
    delta_dim = 1
    for s in delta_shape:
        delta_dim *= s

    key = jax.random.PRNGKey(0)
    k_state, k_act, k_par = jax.random.split(key, 3)

    state = jax.random.normal(k_state, (B, Hg, Wg, C), jnp.float32)
    action_idx = jax.random.randint(k_act, (B,), 0, A)
    action = jax.nn.one_hot(action_idx, A, dtype=jnp.float32)

    params = init_params(k_par, c=C, a=A, embed_dim=embed_dim,
                         hidden_dim=hidden_dim, delta_dim=delta_dim)

    next_state_pred, attention_weight = integrated_forward(
        state, action, params, num_heads, delta_shape)
    jax.block_until_ready((next_state_pred, attention_weight))

    assert next_state_pred.shape == (B,) + delta_shape
    assert attention_weight.shape == (B, 1, Hg * Wg)

    ref_pred, ref_attn = _reference_forward(state, action, params, num_heads, delta_shape)
    assert bool(jnp.allclose(next_state_pred, ref_pred, atol=1e-2, rtol=1e-2))
    assert bool(jnp.allclose(attention_weight, ref_attn, atol=1e-2, rtol=1e-2))

    print("KERNEL_OK")
</pallas_src>

<mosaic_0001>
module attributes {stable_mosaic.version = 11 : i64} {
  func.func @_integrated_kernel(%arg0: i32, %arg1: memref<32x3xf32, #tpu.memory_space<vmem>>, %arg2: memref<2x1x4xf32, #tpu.memory_space<vmem>>, %arg3: memref<3x32xf32, #tpu.memory_space<vmem>>, %arg4: memref<1x32xf32, #tpu.memory_space<vmem>>, %arg5: memref<4x32xf32, #tpu.memory_space<vmem>>, %arg6: memref<1x32xf32, #tpu.memory_space<vmem>>, %arg7: memref<32x64xf32, #tpu.memory_space<vmem>>, %arg8: memref<1x64xf32, #tpu.memory_space<vmem>>, %arg9: memref<32x32xf32, #tpu.memory_space<vmem>>, %arg10: memref<1x32xf32, #tpu.memory_space<vmem>>, %arg11: memref<32x64xf32, #tpu.memory_space<vmem>>, %arg12: memref<1x64xf32, #tpu.memory_space<vmem>>, %arg13: memref<64x48xf32, #tpu.memory_space<vmem>>, %arg14: memref<1x48xf32, #tpu.memory_space<vmem>>, %arg15: memref<2x128xf32, #tpu.memory_space<vmem>>) attributes {dimension_semantics = [#tpu.dimension_semantics<arbitrary>], iteration_bounds = array<i64: 1>, scalar_prefetch = 0 : i64, scratch_operands = 0 : i64, tpu.core_type = #tpu.core_type<tc>, window_params = [{pipeline_mode = #tpu.pipeline_mode<synchronous>, transform_indices = @transform_0, window_bounds = array<i64: 32, 3>}, {pipeline_mode = #tpu.pipeline_mode<synchronous>, transform_indices = @transform_1, window_bounds = array<i64: 2, 1, 4>}, {pipeline_mode = #tpu.pipeline_mode<synchronous>, transform_indices = @transform_2, window_bounds = array<i64: 3, 32>}, {pipeline_mode = #tpu.pipeline_mode<synchronous>, transform_indices = @transform_3, window_bounds = array<i64: 1, 32>}, {pipeline_mode = #tpu.pipeline_mode<synchronous>, transform_indices = @transform_4, window_bounds = array<i64: 4, 32>}, {pipeline_mode = #tpu.pipeline_mode<synchronous>, transform_indices = @transform_5, window_bounds = array<i64: 1, 32>}, {pipeline_mode = #tpu.pipeline_mode<synchronous>, transform_indices = @transform_6, window_bounds = array<i64: 32, 64>}, {pipeline_mode = #tpu.pipeline_mode<synchronous>, transform_indices = @transform_7, window_bounds = array<i64: 1, 64>}, {pipeline_mode = #tpu.pipeline_mode<synchronous>, transform_indices = @transform_8, window_bounds = array<i64: 32, 32>}, {pipeline_mode = #tpu.pipeline_mode<synchronous>, transform_indices = @transform_9, window_bounds = array<i64: 1, 32>}, {pipeline_mode = #tpu.pipeline_mode<synchronous>, transform_indices = @transform_10, window_bounds = array<i64: 32, 64>}, {pipeline_mode = #tpu.pipeline_mode<synchronous>, transform_indices = @transform_11, window_bounds = array<i64: 1, 64>}, {pipeline_mode = #tpu.pipeline_mode<synchronous>, transform_indices = @transform_12, window_bounds = array<i64: 64, 48>}, {pipeline_mode = #tpu.pipeline_mode<synchronous>, transform_indices = @transform_13, window_bounds = array<i64: 1, 48>}, {pipeline_mode = #tpu.pipeline_mode<synchronous>, transform_indices = @transform_14, window_bounds = array<i64: 2, 128>}]} {
    %c0 = arith.constant 0 : index
    %c0_0 = arith.constant 0 : index
    %0 = vector.load %arg1[%c0, %c0_0] : memref<32x3xf32, #tpu.memory_space<vmem>>, vector<32x3xf32>
    %c0_1 = arith.constant 0 : index
    %c0_2 = arith.constant 0 : index
    %c0_3 = arith.constant 0 : index
    %1 = vector.load %arg2[%c0_1, %c0_2, %c0_3] : memref<2x1x4xf32, #tpu.memory_space<vmem>>, vector<2x1x4xf32>
    %c0_4 = arith.constant 0 : index
    %c0_5 = arith.constant 0 : index
    %2 = vector.load %arg4[%c0_4, %c0_5] : memref<1x32xf32, #tpu.memory_space<vmem>>, vector<1x32xf32>
    %3 = vector.extract_strided_slice %0 {offsets = [0, 0], sizes = [32, 1], strides = [1, 1]} : vector<32x3xf32> to vector<32x1xf32>
    %c0_6 = arith.constant 0 : index
    %c0_7 = arith.constant 0 : index
    %4 = vector.load %arg3[%c0_6, %c0_7] : memref<3x32xf32, #tpu.memory_space<vmem>>, vector<1x32xf32>
    %5 = vector.broadcast %3 : vector<32x1xf32> to vector<32x32xf32>
    %6 = vector.broadcast %4 : vector<1x32xf32> to vector<32x32xf32>
    %7 = arith.mulf %5, %6 : vector<32x32xf32>
    %8 = vector.broadcast %2 : vector<1x32xf32> to vector<32x32xf32>
    %9 = arith.addf %8, %7 : vector<32x32xf32>
    %10 = vector.extract_strided_slice %0 {offsets = [0, 1], sizes = [32, 1], strides = [1, 1]} : vector<32x3xf32> to vector<32x1xf32>
    %c1 = arith.constant 1 : index
    %c0_8 = arith.constant 0 : index
    %11 = vector.load %arg3[%c1, %c0_8] : memref<3x32xf32, #tpu.memory_space<vmem>>, vector<1x32xf32>
    %12 = vector.broadcast %10 : vector<32x1xf32> to vector<32x32xf32>
    %13 = vector.broadcast %11 : vector<1x32xf32> to vector<32x32xf32>
    %14 = arith.mulf %12, %13 : vector<32x32xf32>
    %15 = arith.addf %9, %14 : vector<32x32xf32>
    %16 = vector.extract_strided_slice %0 {offsets = [0, 2], sizes = [32, 1], strides = [1, 1]} : vector<32x3xf32> to vector<32x1xf32>
    %c2 = arith.constant 2 : index
    %c0_9 = arith.constant 0 : index
    %17 = vector.load %arg3[%c2, %c0_9] : memref<3x32xf32, #tpu.memory_space<vmem>>, vector<1x32xf32>
    %18 = vector.broadcast %16 : vector<32x1xf32> to vector<32x32xf32>
    %19 = vector.broadcast %17 : vector<1x32xf32> to vector<32x32xf32>
    %20 = arith.mulf %18, %19 : vector<32x32xf32>
    %21 = arith.addf %15, %20 : vector<32x32xf32>
    %c0_10 = arith.constant 0 : index
    %c0_11 = arith.constant 0 : index
    %22 = vector.load %arg6[%c0_10, %c0_11] : memref<1x32xf32, #tpu.memory_space<vmem>>, vector<1x32xf32>
    %23 = vector.extract_strided_slice %1 {offsets = [0, 0, 0], sizes = [2, 1, 1], strides = [1, 1, 1]} : vector<2x1x4xf32> to vector<2x1x1xf32>
    %c0_12 = arith.constant 0 : index
    %c0_13 = arith.constant 0 : index
    %24 = vector.load %arg5[%c0_12, %c0_13] : memref<4x32xf32, #tpu.memory_space<vmem>>, vector<1x32xf32>
    %25 = vector.shape_cast %24 : vector<1x32xf32> to vector<1x1x32xf32>
    %26 = vector.broadcast %23 : vector<2x1x1xf32> to vector<2x1x32xf32>
    %27 = vector.broadcast %25 : vector<1x1x32xf32> to vector<2x1x32xf32>
    %28 = arith.mulf %26, %27 : vector<2x1x32xf32>
    %29 = vector.shape_cast %22 : vector<1x32xf32> to vector<1x1x32xf32>
    %30 = vector.broadcast %29 : vector<1x1x32xf32> to vector<2x1x32xf32>
    %31 = arith.addf %30, %28 : vector<2x1x32xf32>
    %32 = vector.extract_strided_slice %1 {offsets = [0, 0, 1], sizes = [2, 1, 1], strides = [1, 1, 1]} : vector<2x1x4xf32> to vector<2x1x1xf32>
    %c1_14 = arith.constant 1 : index
    %c0_15 = arith.constant 0 : index
    %33 = vector.load %arg5[%c1_14, %c0_15] : memref<4x32xf32, #tpu.memory_space<vmem>>, vector<1x32xf32>
    %34 = vector.shape_cast %33 : vector<1x32xf32> to vector<1x1x32xf32>
    %35 = vector.broadcast %32 : vector<2x1x1xf32> to vector<2x1x32xf32>
    %36 = vector.broadcast %34 : vector<1x1x32xf32> to vector<2x1x32xf32>
    %37 = arith.mulf %35, %36 : vector<2x1x32xf32>
    %38 = arith.addf %31, %37 : vector<2x1x32xf32>
    %39 = vector.extract_strided_slice %1 {offsets = [0, 0, 2], sizes = [2, 1, 1], strides = [1, 1, 1]} : vector<2x1x4xf32> to vector<2x1x1xf32>
    %c2_16 = arith.constant 2 : index
    %c0_17 = arith.constant 0 : index
    %40 = vector.load %arg5[%c2_16, %c0_17] : memref<4x32xf32, #tpu.memory_space<vmem>>, vector<1x32xf32>
    %41 = vector.shape_cast %40 : vector<1x32xf32> to vector<1x1x32xf32>
    %42 = vector.broadcast %39 : vector<2x1x1xf32> to vector<2x1x32xf32>
    %43 = vector.broadcast %41 : vector<1x1x32xf32> to vector<2x1x32xf32>
    %44 = arith.mulf %42, %43 : vector<2x1x32xf32>
    %45 = arith.addf %38, %44 : vector<2x1x32xf32>
    %46 = vector.extract_strided_slice %1 {offsets = [0, 0, 3], sizes = [2, 1, 1], strides = [1, 1, 1]} : vector<2x1x4xf32> to vector<2x1x1xf32>
    %c3 = arith.constant 3 : index
    %c0_18 = arith.constant 0 : index
    %47 = vector.load %arg5[%c3, %c0_18] : memref<4x32xf32, #tpu.memory_space<vmem>>, vector<1x32xf32>
    %48 = vector.shape_cast %47 : vector<1x32xf32> to vector<1x1x32xf32>
    %49 = vector.broadcast %46 : vector<2x1x1xf32> to vector<2x1x32xf32>
    %50 = vector.broadcast %48 : vector<1x1x32xf32> to vector<2x1x32xf32>
    %51 = arith.mulf %49, %50 : vector<2x1x32xf32>
    %52 = arith.addf %45, %51 : vector<2x1x32xf32>
    %c0_19 = arith.constant 0 : index
    %c0_20 = arith.constant 0 : index
    %53 = vector.load %arg7[%c0_19, %c0_20] : memref<32x64xf32, #tpu.memory_space<vmem>>, vector<32x64xf32>
    %cst = arith.constant dense<0.000000e+00> : vector<32x64xf32>
    %54 = tpu.matmul %21, %53, %cst {dimension_numbers = #tpu.dot_dimension_numbers<[1], [0], [0], [1], [0, 0, 1, 1], [], []>} : vector<32x32xf32>, vector<32x64xf32>, vector<32x64xf32> -> vector<32x64xf32>
    %c0_21 = arith.constant 0 : index
    %c0_22 = arith.constant 0 : index
    %55 = vector.load %arg8[%c0_21, %c0_22] : memref<1x64xf32, #tpu.memory_space<vmem>>, vector<1x64xf32>
    %56 = vector.broadcast %55 : vector<1x64xf32> to vector<32x64xf32>
    %57 = arith.addf %54, %56 : vector<32x64xf32>
    %58 = vector.shape_cast %57 : vector<32x64xf32> to vector<2x16x64xf32>
    %59 = vector.extract_strided_slice %58 {offsets = [0, 0, 0], sizes = [2, 16, 32], strides = [1, 1, 1]} : vector<2x16x64xf32> to vector<2x16x32xf32>
    %60 = vector.extract_strided_slice %58 {offsets = [0, 0, 32], sizes = [2, 16, 32], strides = [1, 1, 1]} : vector<2x16x64xf32> to vector<2x16x32xf32>
    %61 = tpu.iota {dimensions = array<i32: 1>} : vector<4x32xi32>
    %62 = tpu.iota {dimensions = array<i32: 0>} : vector<4x32xi32>
    %c8_i32 = arith.constant 8 : i32
    %63 = vector.broadcast %c8_i32 : i32 to vector<4x32xi32>
    %64 = arith.muli %62, %63 : vector<4x32xi32>
    %65 = arith.cmpi sge, %61, %64 : vector<4x32xi32>
    %c8_i32_23 = arith.constant 8 : i32
    %66 = vector.broadcast %c8_i32_23 : i32 to vector<4x32xi32>
    %67 = arith.addi %64, %66 : vector<4x32xi32>
    %68 = arith.cmpi slt, %61, %67 : vector<4x32xi32>
    %69 = arith.andi %65, %68 : vector<4x32xi1>
    %cst_24 = arith.constant 1.000000e+00 : f32
    %cst_25 = arith.constant 0.000000e+00 : f32
    %70 = vector.broadcast %cst_24 : f32 to vector<4x32xf32>
    %71 = vector.broadcast %cst_25 : f32 to vector<4x32xf32>
    %72 = arith.select %69, %70, %71 : vector<4x32xi1>, vector<4x32xf32>
    %73 = vector.shape_cast %72 : vector<4x32xf32> to vector<1x4x32xf32>
    %74 = vector.broadcast %52 : vector<2x1x32xf32> to vector<2x4x32xf32>
    %75 = vector.broadcast %73 : vector<1x4x32xf32> to vector<2x4x32xf32>
    %76 = arith.mulf %74, %75 : vector<2x4x32xf32>
    "tpu.trace_start"() <{level = 10 : i32, message = "bhe,bne->bhn"}> : () -> ()
    %cst_26 = arith.constant dense<0.000000e+00> : vector<2x4x16xf32>
    %77 = tpu.matmul %76, %59, %cst_26 {dimension_numbers = #tpu.dot_dimension_numbers<[2], [2], [1], [1], [0, 0, 0, 1, 1, 1], [0], [0]>} : vector<2x4x32xf32>, vector<2x16x32xf32>, vector<2x4x16xf32> -> vector<2x4x16xf32>
    "tpu.trace_stop"() : () -> ()
    %cst_27 = arith.constant 0.353553385 : f32
    %78 = vector.broadcast %cst_27 : f32 to vector<2x4x16xf32>
    %79 = arith.mulf %77, %78 : vector<2x4x16xf32>
    %cst_28 = arith.constant dense<0xFF800000> : vector<2x4xf32>
    %80 = vector.multi_reduction <maximumf>, %79, %cst_28 [2] : vector<2x4x16xf32> to vector<2x4xf32>
    %81 = vector.shape_cast %80 : vector<2x4xf32> to vector<2x4x1xf32>
    %82 = vector.broadcast %81 : vector<2x4x1xf32> to vector<2x4x16xf32>
    %83 = arith.subf %79, %82 : vector<2x4x16xf32>
    %84 = math.exp %83 : vector<2x4x16xf32>
    %cst_29 = arith.constant dense<0.000000e+00> : vector<2x4xf32>
    %85 = vector.multi_reduction <add>, %84, %cst_29 [2] : vector<2x4x16xf32> to vector<2x4xf32>
    %86 = vector.shape_cast %85 : vector<2x4xf32> to vector<2x4x1xf32>
    %87 = tpu.reciprocal %86 {approx = true} : vector<2x4x1xf32> -> vector<2x4x1xf32>
    %88 = vector.broadcast %87 : vector<2x4x1xf32> to vector<2x4x16xf32>
    %89 = arith.mulf %84, %88 : vector<2x4x16xf32>
    %cst_30 = arith.constant dense<0.000000e+00> : vector<2x16xf32>
    %90 = vector.multi_reduction <add>, %89, %cst_30 [1] : vector<2x4x16xf32> to vector<2x16xf32>
    %cst_31 = arith.constant 2.500000e-01 : f32
    %91 = vector.broadcast %cst_31 : f32 to vector<2x16xf32>
    %92 = arith.mulf %90, %91 : vector<2x16xf32>
    "tpu.trace_start"() <{level = 10 : i32, message = "bhn,bne->bhe"}> : () -> ()
    %cst_32 = arith.constant dense<0.000000e+00> : vector<2x4x32xf32>
    %93 = tpu.matmul %89, %60, %cst_32 {dimension_numbers = #tpu.dot_dimension_numbers<[2], [1], [1], [2], [0, 0, 0, 1, 1, 2], [0], [0]>} : vector<2x4x16xf32>, vector<2x16x32xf32>, vector<2x4x32xf32> -> vector<2x4x32xf32>
    "tpu.trace_stop"() : () -> ()
    %94 = vector.shape_cast %72 : vector<4x32xf32> to vector<1x4x32xf32>
    %95 = vector.broadcast %94 : vector<1x4x32xf32> to vector<2x4x32xf32>
    %96 = arith.mulf %93, %95 : vector<2x4x32xf32>
    %cst_33 = arith.constant dense<0.000000e+00> : vector<2x32xf32>
    %97 = vector.multi_reduction <add>, %96, %cst_33 [1] : vector<2x4x32xf32> to vector<2x32xf32>
    %c0_34 = arith.constant 0 : index
    %c0_35 = arith.constant 0 : index
    %98 = vector.load %arg9[%c0_34, %c0_35] : memref<32x32xf32, #tpu.memory_space<vmem>>, vector<32x32xf32>
    %cst_36 = arith.constant dense<0.000000e+00> : vector<2x32xf32>
    %99 = tpu.matmul %97, %98, %cst_36 {dimension_numbers = #tpu.dot_dimension_numbers<[1], [0], [0], [1], [0, 0, 1, 1], [], []>} : vector<2x32xf32>, vector<32x32xf32>, vector<2x32xf32> -> vector<2x32xf32>
    %c0_37 = arith.constant 0 : index
    %c0_38 = arith.constant 0 : index
    %100 = vector.load %arg10[%c0_37, %c0_38] : memref<1x32xf32, #tpu.memory_space<vmem>>, vector<1x32xf32>
    %101 = vector.broadcast %100 : vector<1x32xf32> to vector<2x32xf32>
    %102 = arith.addf %99, %101 : vector<2x32xf32>
    %c0_39 = arith.constant 0 : index
    %c0_40 = arith.constant 0 : index
    %103 = vector.load %arg11[%c0_39, %c0_40] : memref<32x64xf32, #tpu.memory_space<vmem>>, vector<32x64xf32>
    %cst_41 = arith.constant dense<0.000000e+00> : vector<2x64xf32>
    %104 = tpu.matmul %102, %103, %cst_41 {dimension_numbers = #tpu.dot_dimension_numbers<[1], [0], [0], [1], [0, 0, 1, 1], [], []>} : vector<2x32xf32>, vector<32x64xf32>, vector<2x64xf32> -> vector<2x64xf32>
    %c0_42 = arith.constant 0 : index
    %c0_43 = arith.constant 0 : index
    %105 = vector.load %arg12[%c0_42, %c0_43] : memref<1x64xf32, #tpu.memory_space<vmem>>, vector<1x64xf32>
    %106 = vector.broadcast %105 : vector<1x64xf32> to vector<2x64xf32>
    %107 = arith.addf %104, %106 : vector<2x64xf32>
    %cst_44 = arith.constant 0.000000e+00 : f32
    %108 = vector.broadcast %cst_44 : f32 to vector<2x64xf32>
    %109 = arith.maximumf %107, %108 : vector<2x64xf32>
    %c0_45 = arith.constant 0 : index
    %c0_46 = arith.constant 0 : index
    %110 = vector.load %arg13[%c0_45, %c0_46] : memref<64x48xf32, #tpu.memory_space<vmem>>, vector<64x48xf32>
    %cst_47 = arith.constant dense<0.000000e+00> : vector<2x48xf32>
    %111 = tpu.matmul %109, %110, %cst_47 {dimension_numbers = #tpu.dot_dimension_numbers<[1], [0], [0], [1], [0, 0, 1, 1], [], []>} : vector<2x64xf32>, vector<64x48xf32>, vector<2x48xf32> -> vector<2x48xf32>
    %c0_48 = arith.constant 0 : index
    %c0_49 = arith.constant 0 : index
    %112 = vector.load %arg14[%c0_48, %c0_49] : memref<1x48xf32, #tpu.memory_space<vmem>>, vector<1x48xf32>
    %113 = vector.broadcast %112 : vector<1x48xf32> to vector<2x48xf32>
    %114 = arith.addf %111, %113 : vector<2x48xf32>
    %c0_50 = arith.constant 0 : index
    %c0_51 = arith.constant 0 : index
    %115 = vector.load %arg15[%c0_50, %c0_51] : memref<2x128xf32, #tpu.memory_space<vmem>>, vector<2x48xf32>
    tpu.vector_store %arg15[%c0_50, %c0_51], %114 {strides = array<i32>} : memref<2x128xf32, #tpu.memory_space<vmem>>, vector<2x48xf32>,
    %c0_52 = arith.constant 0 : index
    %c48 = arith.constant 48 : index
    %116 = vector.load %arg15[%c0_52, %c48] : memref<2x128xf32, #tpu.memory_space<vmem>>, vector<2x16xf32>
    tpu.vector_store %arg15[%c0_52, %c48], %92 {strides = array<i32>} : memref<2x128xf32, #tpu.memory_space<vmem>>, vector<2x16xf32>,
    %cst_53 = arith.constant 0.000000e+00 : f32
    %117 = vector.broadcast %cst_53 : f32 to vector<2x64xf32>
    %c0_54 = arith.constant 0 : index
    %c64 = arith.constant 64 : index
    %118 = vector.load %arg15[%c0_54, %c64] : memref<2x128xf32, #tpu.memory_space<vmem>>, vector<2x64xf32>
    tpu.vector_store %arg15[%c0_54, %c64], %117 {strides = array<i32>} : memref<2x128xf32, #tpu.memory_space<vmem>>, vector<2x64xf32>,
    return
  }
  func.func @transform_0(%arg0: i32) -> (i32, i32) {
    %c0_i32 = arith.constant 0 : i32
    %c0_i32_0 = arith.constant 0 : i32
    %c0_i32_1 = arith.constant 0 : i32
    return %c0_i32, %c0_i32_0 : i32, i32
  }
  func.func @transform_1(%arg0: i32) -> (i32, i32, i32) {
    %c0_i32 = arith.constant 0 : i32
    %c0_i32_0 = arith.constant 0 : i32
    %c0_i32_1 = arith.constant 0 : i32
    %c0_i32_2 = arith.constant 0 : i32
    return %c0_i32, %c0_i32_0, %c0_i32_1 : i32, i32, i32
  }
  func.func @transform_2(%arg0: i32) -> (i32, i32) {
    %c0_i32 = arith.constant 0 : i32
    %c0_i32_0 = arith.constant 0 : i32
    %c0_i32_1 = arith.constant 0 : i32
    return %c0_i32, %c0_i32_0 : i32, i32
  }
  func.func @transform_3(%arg0: i32) -> (i32, i32) {
    %c0_i32 = arith.constant 0 : i32
    %c0_i32_0 = arith.constant 0 : i32
    %c0_i32_1 = arith.constant 0 : i32
    return %c0_i32, %c0_i32_0 : i32, i32
  }
  func.func @transform_4(%arg0: i32) -> (i32, i32) {
    %c0_i32 = arith.constant 0 : i32
    %c0_i32_0 = arith.constant 0 : i32
    %c0_i32_1 = arith.constant 0 : i32
    return %c0_i32, %c0_i32_0 : i32, i32
  }
  func.func @transform_5(%arg0: i32) -> (i32, i32) {
    %c0_i32 = arith.constant 0 : i32
    %c0_i32_0 = arith.constant 0 : i32
    %c0_i32_1 = arith.constant 0 : i32
    return %c0_i32, %c0_i32_0 : i32, i32
  }
  func.func @transform_6(%arg0: i32) -> (i32, i32) {
    %c0_i32 = arith.constant 0 : i32
    %c0_i32_0 = arith.constant 0 : i32
    %c0_i32_1 = arith.constant 0 : i32
    return %c0_i32, %c0_i32_0 : i32, i32
  }
  func.func @transform_7(%arg0: i32) -> (i32, i32) {
    %c0_i32 = arith.constant 0 : i32
    %c0_i32_0 = arith.constant 0 : i32
    %c0_i32_1 = arith.constant 0 : i32
    return %c0_i32, %c0_i32_0 : i32, i32
  }
  func.func @transform_8(%arg0: i32) -> (i32, i32) {
    %c0_i32 = arith.constant 0 : i32
    %c0_i32_0 = arith.constant 0 : i32
    %c0_i32_1 = arith.constant 0 : i32
    return %c0_i32, %c0_i32_0 : i32, i32
  }
  func.func @transform_9(%arg0: i32) -> (i32, i32) {
    %c0_i32 = arith.constant 0 : i32
    %c0_i32_0 = arith.constant 0 : i32
    %c0_i32_1 = arith.constant 0 : i32
    return %c0_i32, %c0_i32_0 : i32, i32
  }
  func.func @transform_10(%arg0: i32) -> (i32, i32) {
    %c0_i32 = arith.constant 0 : i32
    %c0_i32_0 = arith.constant 0 : i32
    %c0_i32_1 = arith.constant 0 : i32
    return %c0_i32, %c0_i32_0 : i32, i32
  }
  func.func @transform_11(%arg0: i32) -> (i32, i32) {
    %c0_i32 = arith.constant 0 : i32
    %c0_i32_0 = arith.constant 0 : i32
    %c0_i32_1 = arith.constant 0 : i32
    return %c0_i32, %c0_i32_0 : i32, i32
  }
  func.func @transform_12(%arg0: i32) -> (i32, i32) {
    %c0_i32 = arith.constant 0 : i32
    %c0_i32_0 = arith.constant 0 : i32
    %c0_i32_1 = arith.constant 0 : i32
    return %c0_i32, %c0_i32_0 : i32, i32
  }
  func.func @transform_13(%arg0: i32) -> (i32, i32) {
    %c0_i32 = arith.constant 0 : i32
    %c0_i32_0 = arith.constant 0 : i32
    %c0_i32_1 = arith.constant 0 : i32
    return %c0_i32, %c0_i32_0 : i32, i32
  }
  func.func @transform_14(%arg0: i32) -> (i32, i32) {
    %c0_i32 = arith.constant 0 : i32
    %c0_i32_0 = arith.constant 0 : i32
    %c0_i32_1 = arith.constant 0 : i32
    return %c0_i32, %c0_i32_0 : i32, i32
  }
}

</mosaic_0001>

<bundles_post_ra>
// kernel: tpu_custom_call.1
= control target key start
LH: loop header
LB: loop body
LE: loop exit
PB: predicated region body
PF: predicated region fallthrough
CT: control target
= control target key end

     0   :  { %v1292_v1 = vmov 1   ;;  %v1293_v2 = vmov 0   ;;  %s1580_s0 = inlined_call_operand.vmem [shape: f32[32,3], index: 0, kind: input, shape index: {}]   ;;  %s1581_s1 = inlined_call_operand.vmem [shape: f32[2,1,4], index: 1, kind: input, shape index: {}]   ;;  %s1582_s2 = inlined_call_operand.vmem [shape: f32[3,32], index: 2, kind: input, shape index: {}]   ;;  %s1583_s3 = inlined_call_operand.vmem [shape: f32[1,32], index: 3, kind: input, shape index: {}]   ;;  %s1584_s4 = inlined_call_operand.vmem [shape: f32[4,32], index: 4, kind: input, shape index: {}]   ;;  %s1585_s5 = inlined_call_operand.vmem [shape: f32[1,32], index: 5, kind: input, shape index: {}]   ;;  %s1586_s6 = inlined_call_operand.vmem [shape: f32[32,64], index: 6, kind: input, shape index: {}]   ;;  %s1587_s7 = inlined_call_operand.vmem [shape: f32[1,64], index: 7, kind: input, shape index: {}]   ;;  %s1588_s8 = inlined_call_operand.vmem [shape: f32[32,32], index: 8, kind: input, shape index: {}]   ;;  %s1589_s9 = inlined_call_operand.vmem [shape: f32[1,32], index: 9, kind: input, shape index: {}]   ;;  %s1590_s10 = inlined_call_operand.vmem [shape: f32[32,64], index: 10, kind: input, shape index: {}]   ;;  %s1591_s11 = inlined_call_operand.vmem [shape: f32[1,64], index: 11, kind: input, shape index: {}]   ;;  %s1592_s12 = inlined_call_operand.vmem [shape: f32[64,48], index: 12, kind: input, shape index: {}]   ;;  %s1593_s13 = inlined_call_operand.vmem [shape: f32[1,48], index: 13, kind: input, shape index: {}]   ;;  %s1594_s14 = inlined_call_operand.hbm [shape: f32[2,128], index: 14, kind: output, shape index: {}]  }
   0x1   :  { %v48_v0 = vld [vmem:[%s1580_s0] sm:$0xff]  ;;  %1236 = vset.pattern.permute.xlu1 %v1292_v1  ;;  %1235 = vset.pattern.permute.xlu0 %v1293_v2 }
   0x2   :  { %96 = vperm.xlu1 %1236, %v48_v0   ;;  %58 = vperm.xlu0 %1235, %v48_v0  }
   0x3   :  { %19 = vsyncpa [#allocation3], 0  ;;  %v49_v3 = vld [vmem:[%s1580_s0 + $0x8] sm:$0xff]  ;;  %v50_v4 = vld [vmem:[%s1580_s0 + $0x10] sm:$0xff]  ;;  %v1294_v8 = vmov 2   ;;  %v1295_v15 = vmov 3   ;;  %v159_v58 = vlaneseq }
   0x4   :  { %v239_v5 = vld [vmem:[%s1586_s6] sm:$0xff]  ;;  %v240_v6 = vld [vmem:[%s1586_s6 + $0x8] sm:$0xff]  ;;  %v51_v9 = vld [vmem:[%s1580_s0 + $0x18] sm:$0xff]  ;;  %vm250_vm0 = vcmask 261120   ;;  %v1296_v56 = vmov 0.0|0.0   ;;  %vm1297_vm1 = vmmov 0  }
   0x5   :  { %v1179_v7 = vpack.c.bf16 %v240_v6, %v239_v5  ;;  %v241_v10 = vld [vmem:[%s1586_s6 + $0x10] sm:$0xff]  ;;  %v242_v11 = vld [vmem:[%s1586_s6 + $0x18] sm:$0xff]  ;;  %v52_v13 = vld [vmem:[%s1581_s1] sm:$0x1]  ;;  %1191 = vmatprep.subr.bf16.mxu0 %v1296_v56  ;;  %v1298_v57 = vmov 0.0   ;;  %v160_v59 = vshrl.u32 %v159_v58, 7 }
   0x6   :  { %100 = vperm.xlu1 %1236, %v49_v3   ;;  %63 = vperm.xlu0 %1235, %v49_v3   ;;  %v1183_v12 = vpack.c.bf16 %v242_v11, %v241_v10  ;;  %v53_v14 = vld [vmem:[%s1581_s1 + $0x1] sm:$0x1]  ;;  %v1034_v16 = vld [vmem:[%s1582_s2] ss:$0 sm:$0xff]  ;;  %v1037_v26 = vld [vmem:[%s1582_s2 + $0x2] ss:$0 sm:$0xff] }
   0x7   :  { %1180 = vmatprep.subr.bf16.mxu1 %v1179_v7  ;;  %v1035_v20 = vld [vmem:[%s1583_s3] ss:$0 sm:$0xff]  ;;  %v1036_v23 = vld [vmem:[%s1582_s2 + $0x1] ss:$0 sm:$0xff]  ;;  %1121 = vmatprep.mubr.msk.f32.mxu0 %vm1297_vm1, %v1298_v57  ;;  %v1429_v61 = vsub.s32 0, %v160_v59  ;;  %vm1458_vm4 = vmpackc.low %vm250_vm0, %vm250_vm0  ;;  %vm532_vm6 = vcmask 125952  }
   0x8   :  { %1182 = vmatpush3.bf16.msra.mxu1 %v1179_v7  ;;  %v152_v5 = vld [vmem:[%s1585_s5] sm:$0x1]  ;;  %v176_v6 = vld [vmem:[%s1584_s4 + $0x1] sm:$0x1]  ;;  %v197_v11 = vld [vmem:[%s1584_s4 + $0x2] sm:$0x1] }
   0x9   :  { %1184 = vmatprep.subr.bf16.mxu1 %v1183_v12  ;;  %vm577_vm7 = vcmask 130048   ;;  %vm760_vm8 = vcmask 1041409   ;;  %vm732_vm9 = vcmask 257024   ;;  %vm934_vm10 = vcmask 523264   ;;  %s1301_s3 = smov [#allocation2]  }
   0xa   :  { %1237 = vset.pattern.permute.xlu1 %v1294_v8  ;;  %68 = vperm.xlu0 %1235, %v50_v4   ;;  %vm1008_vm11 = vcmask 386048   ;;  %vm1016_vm12 = vcmask 517504   ;;  %vm1018_vm13 = vcmask 1041920  }
   0xb   :  { %125 = vperm.xlu1 %1237, %v48_v0   ;;  %v153_v0 = vld [vmem:[%s1584_s4] sm:$0x1] }
   0xc   :  { %1186 = vmatpush3.bf16.msra.mxu1 %v1183_v12 }
   0xd   :  { %1187 = vmatprep.subr.bf16.mxu1 %v1296_v56 }
   0xe   :  { %73 = vperm.xlu0 %1235, %v51_v9  }
   0xf   :  { %129 = vperm.xlu1 %1237, %v49_v3  }
  0x12   :  { %1238 = vset.pattern.permute.xlu0 %v1292_v1 }
  0x13   :  { %1239 = vset.pattern.permute.xlu1 %v1292_v1  ;;  %104 = vperm.xlu0 %1238, %v50_v4  }
  0x14   :  { %108 = vperm.xlu1 %1239, %v51_v9  }
  0x17   :  { %1241 = vset.pattern.permute.xlu0 %v1294_v8 }
  0x18   :  { %1240 = vset.pattern.permute.xlu1 %v1294_v8  ;;  %137 = vperm.xlu0 %1241, %v51_v9  }
  0x19   :  { %133 = vperm.xlu1 %1240, %v50_v4  }
  0x1c   :  { %1244 = vset.pattern.permute.xlu0 %v1293_v2 }
  0x1d   :  { %1242 = vset.pattern.permute.xlu1 %v1293_v2  ;;  %165 = vperm.xlu0 %1244, %v53_v14  }
  0x1e   :  { %156 = vperm.xlu1 %1242, %v52_v13  }
  0x21   :  { %1247 = vset.pattern.permute.xlu0 %v1295_v15 }
  0x22   :  { %1243 = vset.pattern.permute.xlu1 %v1292_v1  ;;  %220 = vperm.xlu0 %1247, %v52_v13  }
  0x23   :  { %178 = vperm.xlu1 %1243, %v52_v13  }
  0x27   :  { %1245 = vset.pattern.permute.xlu1 %v1294_v8 }
  0x28   :  { %199 = vperm.xlu1 %1245, %v52_v13   ;;  %v352_v13 = vmul.u32 8, %v160_v59 }
  0x2c   :  { %1246 = vset.pattern.permute.xlu1 %v1292_v1 }
  0x2d   :  { %186 = vperm.xlu1 %1246, %v53_v14  }
  0x31   :  { %1248 = vset.pattern.permute.xlu1 %v1294_v8 }
  0x32   :  { %207 = vperm.xlu1 %1248, %v53_v14  }
  0x36   :  { %1249 = vset.pattern.permute.xlu1 %v1295_v15 }
  0x37   :  { %228 = vperm.xlu1 %1249, %v53_v14  }
  0x81   :  { %v97_v17 = vpop.permute.xlu1 %96  ;;  %v59_v18 = vpop.permute.xlu0 %58 }
  0x82   :  { %v80_v19 = vmul.f32 %v1034_v16, %v59_v18  ;;  %v115_v27 = vmul.f32 %v1036_v23, %v97_v17  ;;  %v218_v18 = vld [vmem:[%s1584_s4 + $0x3] sm:$0x1]  ;;  %s1299_s4 = smov 96  }
  0x84   :  { %v90_v24 = vadd.f32 %v1035_v20, %v80_v19  ;;  %v349_v19 = vand.u32 127, %v159_v58 }
  0x85   :  { %v101_v21 = vpop.permute.xlu1 %100  ;;  %v64_v22 = vpop.permute.xlu0 %63 }
  0x86   :  { %v81_v25 = vmul.f32 %v1034_v16, %v64_v22  ;;  %v119_v32 = vadd.f32 %v115_v27, %v90_v24  ;;  %v116_v33 = vmul.f32 %v1036_v23, %v101_v21  ;;  %v1038_v24 = vld [vmem:[%s1587_s7] ss:$0 sm:$0xff]  ;;  %vm353_vm2 = vcmp.ge.s32.totalorder %v349_v19, %v352_v13  ;;  %s1300_s7 = smov 48  }
  0x88   :  { %v91_v30 = vadd.f32 %v1035_v20, %v81_v25 }
  0x89   :  { %v69_v28 = vpop.permute.xlu0 %68 }
  0x8a   :  { %v126_v29 = vpop.permute.xlu1 %125  ;;  %v120_v37 = vadd.f32 %v116_v33, %v91_v30  ;;  %v82_v41 = vmul.f32 %v1034_v16, %v69_v28 }
  0x8b   :  { %v144_v31 = vmul.f32 %v1037_v26, %v126_v29 }
  0x8c   :  { %v92_v46 = vadd.f32 %v1035_v20, %v82_v41 }
  0x8d   :  { %v74_v34 = vpop.permute.xlu0 %73  ;;  %v148_v35 = vadd.f32 %v144_v31, %v119_v32 }
  0x8e   :  { %v130_v36 = vpop.permute.xlu1 %129  ;;  %v83_v43 = vmul.f32 %v1034_v16, %v74_v34 }
  0x8f   :  { %v145_v38 = vmul.f32 %v1037_v26, %v130_v36  ;;  %1104 = vmatprep.mubr.msk.f32.mxu1 %vm250_vm0, %v148_v35 }
  0x90   :  { %v93_v48 = vadd.f32 %v1035_v20, %v83_v43  ;;  %v354_v20 = vadd.s32 8, %v352_v13 }
  0x91   :  { %v149_v39 = vadd.f32 %v145_v38, %v120_v37 }
  0x92   :  { %v105_v40 = vpop.permute.xlu0 %104  ;;  %vm355_vm3 = vcmp.lt.s32.totalorder %v349_v19, %v354_v20 }
  0x93   :  { %v109_v42 = vpop.permute.xlu1 %108  ;;  %1105 = vmatmul.mubr.msk.f32.vlgmr.msra.gmra.mrb[0].mxu1 %vm250_vm0, %v149_v39  ;;  %v117_v44 = vmul.f32 %v1036_v23, %v105_v40  ;;  %vm356_vm5 = vmand %vm353_vm2, %vm355_vm3 }
  0x94   :  { %v118_v45 = vmul.f32 %v1036_v23, %v109_v42  ;;  %v1468_v43 = vsel %vm356_vm5, 1.0, %v1298_v57 }
  0x95   :  { %v121_v51 = vadd.f32 %v117_v44, %v92_v46 }
  0x96   :  { %v122_v53 = vadd.f32 %v118_v45, %v93_v48 }
  0x97   :  { %v138_v47 = vpop.permute.xlu0 %137 }
  0x98   :  { %v147_v49 = vmul.f32 %v1037_v26, %v138_v47  ;;  %v134_v50 = vpop.permute.xlu1 %133 }
  0x99   :  { %v146_v52 = vmul.f32 %v1037_v26, %v134_v50 }
  0x9a   :  { %v151_v55 = vadd.f32 %v147_v49, %v122_v53 }
  0x9b   :  { %v150_v54 = vadd.f32 %v146_v52, %v121_v51 }
  0x9c   :  { %v166_v1 = vpop.permute.xlu0 %165 }
  0x9d   :  { %1107 = vmatprep.mubr.msk.f32.mxu1 %vm250_vm0, %v150_v54  ;;  %v157_v60 = vpop.permute.xlu1 %156  ;;  %v171_v14 = vrot.slane %v166_v1, %v1429_v61 }
  0x9e   :  { %1108 = vmatmul.mubr.msk.f32.gmra.mrb[2].mxu1 %vm250_vm0, %v151_v55  ;;  %v162_v63 = vrot.slane %v157_v60, %v1429_v61 }
  0x9f   :  { %1114 = vmatprep.mubr.msk.f32.mxu1 %vm1297_vm1, %v1298_v57  ;;  %v173_v22 = vmul.f32 %v171_v14, %v153_v0 }
  0xa0   :  { %v172_v2 = vmul.f32 %v162_v63, %v153_v0 }
  0xa1   :  { %v221_v12 = vpop.permute.xlu0 %220  ;;  %v175_v30 = vadd.f32 %v173_v22, %v152_v5 }
  0xa2   :  { %v179_v62 = vpop.permute.xlu1 %178  ;;  %v174_v7 = vadd.f32 %v172_v2, %v152_v5  ;;  %v226_v17 = vrot.slane %v221_v12, %v1429_v61 }
  0xa3   :  { %v184_v3 = vrot.slane %v179_v62, %v1429_v61 }
  0xa4   :  { %v235_v26 = vmul.f32 %v226_v17, %v218_v18 }
  0xa5   :  { %v193_v8 = vmul.f32 %v184_v3, %v176_v6 }
  0xa7   :  { %v200_v4 = vpop.permute.xlu1 %199  ;;  %v195_v15 = vadd.f32 %v193_v8, %v174_v7 }
  0xa8   :  { %v205_v9 = vrot.slane %v200_v4, %v1429_v61 }
  0xaa   :  { %v214_v16 = vmul.f32 %v205_v9, %v197_v11 }
  0xac   :  { %v187_v10 = vpop.permute.xlu1 %186  ;;  %v216_v25 = vadd.f32 %v214_v16, %v195_v15 }
  0xad   :  { %v192_v23 = vrot.slane %v187_v10, %v1429_v61 }
  0xae   :  { %v237_v34 = vadd.f32 %v235_v26, %v216_v25 }
  0xaf   :  { %v194_v31 = vmul.f32 %v192_v23, %v176_v6 }
  0xb0   :  { %v363_v42 = vrot.slane %v237_v34, %v1429_v61 }
  0xb1   :  { %v208_v21 = vpop.permute.xlu1 %207  ;;  %v196_v39 = vadd.f32 %v194_v31, %v175_v30 }
  0xb2   :  { %v213_v33 = vrot.slane %v208_v21, %v1429_v61  ;;  %v370_v46 = vmul.f32 %v363_v42, %v1468_v43 }
  0xb4   :  { %v215_v40 = vmul.f32 %v213_v33, %v197_v11 }
  0xb6   :  { %v229_v36 = vpop.permute.xlu1 %228  ;;  %v217_v44 = vadd.f32 %v215_v40, %v196_v39 }
  0xb7   :  { %v234_v41 = vrot.slane %v229_v36, %v1429_v61 }
  0xb9   :  { %v236_v45 = vmul.f32 %v234_v41, %v218_v18 }
  0xbb   :  { %v238_v51 = vadd.f32 %v236_v45, %v217_v44  ;;  %v747_v44 = vld [vmem:[%s1588_s8] sm:$0xff]  ;;  %v748_v45 = vld [vmem:[%s1588_s8 + $0x8] sm:$0xff] }
  0xbd   :  { %v367_v54 = vrot.slane %v238_v51, %v1429_v61  ;;  %v835_v51 = vld [vmem:[%s1590_s10 + $0x8] sm:$0xff] }
  0xbf   :  { %v371_v55 = vmul.f32 %v367_v54, %v1468_v43 }
 0x166   :  { %v1106_v27 = vpop.f32.mrb[0].mxu1 }
 0x167   :  { %v335_v28 = vadd.f32 %v1106_v27, %v1038_v24  ;;  %v329_v29 = vpop.f32.mrb[1].mxu1 }
 0x168   :  { %v330_v32 = vadd.f32 %v1038_v24, %v329_v29 }
 0x16a   :  { %v1250_v37 = vpack.i.bf16 %v335_v28, %v330_v32  ;;  %v1188_v38 = vpack.c.bf16 %v335_v28, %v330_v32 }
 0x16c   :  { %1190 = vmatpush3.bf16.xpose.msk.msra.mxu1 %vm1458_vm4, %v1188_v38 }
 0x16d   :  { %1195 = vmatprep.subr.bf16.mxu1 %v1296_v56 }
 0x171   :  { %v1109_v47 = vpop.f32.mrb[2].mxu1 }
 0x172   :  { %v345_v48 = vadd.f32 %v1109_v47, %v1038_v24  ;;  %v339_v49 = vpop.f32.mrb[3].mxu1  ;;  %v749_v47 = vld [vmem:[%s1588_s8 + $0x10] sm:$0xff] }
 0x173   :  { %v340_v50 = vadd.f32 %v1038_v24, %v339_v49  ;;  %1115 = vmatmul.mubr.msk.f32.vlgmr.msra.gmra.mrb[4].mxu1 %vm250_vm0, %v370_v46  ;;  %v1202_v46 = vpack.c.bf16 %v748_v45, %v747_v44 }
 0x174   :  { %1128 = vmatprep.mubr.msk.f32.mxu1 %vm1297_vm1, %v1298_v57 }
 0x175   :  { %v1255_v52 = vpack.i.bf16 %v345_v48, %v340_v50  ;;  %v1192_v53 = vpack.c.bf16 %v345_v48, %v340_v50  ;;  %v750_v48 = vld [vmem:[%s1588_s8 + $0x18] sm:$0xff]  ;;  %v834_v50 = vld [vmem:[%s1590_s10] sm:$0xff] }
 0x176   :  { %v1205_v49 = vpack.c.bf16 %v750_v48, %v749_v47 }
 0x177   :  { %1194 = vmatpush3.bf16.xpose.msk.msra.mxu0 %vm1458_vm4, %v1192_v53 }
 0x178   :  { %1201 = vmatprep.subr.bf16.mxu0 %v1296_v56 }
 0x17e   :  { %1122 = vmatmul.mubr.msk.f32.vlgmr.msra.gmra.mrb[0].mxu0 %vm250_vm0, %v371_v55 }
 0x17f   :  { %1146 = vmatprep.mubr.msk.f32.mxu0 %vm1297_vm1, %v1298_v57  ;;  %1203 = vmatpush3.bf16.msra.mxu0 %v1202_v46 }
 0x180   :  { %1204 = vmatprep.subr.bf16.mxu0 %v1296_v56 }
 0x183   :  { %1206 = vmatpush3.bf16.msra.mxu0 %v1205_v49 }
 0x184   :  { %1213 = vmatprep.subr.bf16.mxu0 %v1296_v56 }
 0x246   :  { %v447_v58 = vpop.f32.mrb[4].mxu1 }
 0x247   :  { %v530_v59 = vmul.f32 0.35355338, %v447_v58  ;;  %v1116_v60 = vpop.f32.mrb[5].mxu1 }
 0x249   :  { %v533_v62 = vsel %vm532_vm6, %v530_v59, -inf }
 0x24a   :  { %534 = vmax.xlane.f32.xlu0 %v533_v62 }
 0x251   :  { %v526_v63 = vpop.f32.mrb[0].mxu0 }
 0x252   :  { %v531_v0 = vmul.f32 0.35355338, %v526_v63  ;;  %v1123_v1 = vpop.f32.mrb[1].mxu0 }
 0x254   :  { %v536_v61 = vsel %vm532_vm6, %v531_v0, -inf }
 0x255   :  { %537 = vmax.xlane.f32.xlu1 %v536_v61 }
 0x266   :  { %1251 = vrot.lane.b32.xlu1 %v1250_v37, %s1299_s4 }
 0x2d7   :  { %v535_v2 = vpop.xlane.xlu0 %534 }
 0x2d8   :  { %v539_v3 = vsub.f32 %v530_v59, %v535_v2 }
 0x2da   :  { %v541_v4 = vmul.f32 1.442695, %v539_v3 }
 0x2dc   :  { %1260 = vpow2.f32 %v541_v4 }
 0x2e2   :  { %v538_v5 = vpop.xlane.xlu1 %537 }
 0x2e3   :  { %v540_v6 = vsub.f32 %v531_v0, %v538_v5 }
 0x2e5   :  { %v543_v7 = vmul.f32 1.442695, %v540_v6 }
 0x2e6   :  { %v1261_v8 = vpop.eup %1260  ;;  %v1252_v9 = vpop.permute.xlu1 %1251 }
 0x2e7   :  { %1262 = vpow2.f32 %v543_v7  ;;  %v1254_v10 = vunpack.i.h.bf16 %v1252_v9  ;;  %v1253_v11 = vunpack.i.l.bf16 %v1252_v9  ;;  %v545_v12 = vsel %vm532_vm6, %v1261_v8, 0.0 }
 0x2e8   :  { %546 = vadd.xlane.f32.xlu0 %v545_v12  ;;  %v837_v12 = vld [vmem:[%s1590_s10 + $0x18] sm:$0xff] }
 0x2e9   :  { %v1196_v13 = vpack.c.bf16 %v1254_v10, %v1253_v11 }
 0x2eb   :  { %1197 = vmatpush3.bf16.msra.mxu1 %v1196_v13 }
 0x2ec   :  { %1198 = vmatprep.subr.bf16.mxu1 %v1296_v56 }
 0x2f1   :  { %v1263_v14 = vpop.eup %1262 }
 0x2f2   :  { %v548_v15 = vsel %vm532_vm6, %v1263_v14, 0.0 }
 0x2f3   :  { %549 = vadd.xlane.f32.xlu0 %v548_v15  ;;  %v920_v15 = vld [vmem:[%s1592_s12 + $0x8] sm:$0xff] }
 0x309   :  { %1256 = vrot.lane.b32.xlu0 %v1255_v52, %s1299_s4  ;;  %v1208_v52 = vpack.c.bf16 %v835_v51, %v834_v50 }
 0x375   :  { %v547_v16 = vpop.xlane.xlu0 %546 }
 0x376   :  { %1264 = vrcp.f32 %v547_v16  ;;  %v921_v16 = vld [vmem:[%s1592_s12 + $0x10] sm:$0xff] }
 0x380   :  { %v1265_v17 = vpop.eup %1264  ;;  %v550_v18 = vpop.xlane.xlu0 %549 }
 0x381   :  { %v553_v19 = vmul.f32 %v1265_v17, %v1261_v8  ;;  %1266 = vrcp.f32 %v550_v18  ;;  %v922_v18 = vld [vmem:[%s1592_s12 + $0x18] sm:$0xff] }
 0x383   :  { %1129 = vmatmul.mubr.msk.f32.vlgmr.msra.gmra.mrb[6].mxu1 %vm577_vm7, %v553_v19  ;;  %v555_v20 = vsel %vm532_vm6, %v553_v19, 0.0  ;;  %v1217_v19 = vpack.c.bf16 %v922_v18, %v921_v16 }
 0x384   :  { %v1257_v21 = vpop.permute.xlu0 %1256  ;;  %1135 = vmatprep.mubr.msk.f32.mxu1 %vm1297_vm1, %v1298_v57  ;;  %v556_v22 = vrot.slane %v555_v20, 4 }
 0x385   :  { %v1259_v23 = vunpack.i.h.bf16 %v1257_v21  ;;  %v1258_v24 = vunpack.i.l.bf16 %v1257_v21  ;;  %v924_v21 = vld [vmem:[%s1592_s12 + $0x28] sm:$0xff] }
 0x386   :  { %v557_v26 = vadd.f32 %v556_v22, %v555_v20  ;;  %v923_v20 = vld [vmem:[%s1592_s12 + $0x20] sm:$0xff] }
 0x387   :  { %v1199_v25 = vpack.c.bf16 %v1259_v23, %v1258_v24  ;;  %v1220_v22 = vpack.c.bf16 %v924_v21, %v923_v20  ;;  %v1051_v23 = vld [vmem:[%s1589_s9] ss:$0 sm:$0xff] }
 0x388   :  { %v558_v28 = vrot.slane %v557_v26, 2 }
 0x389   :  { %1200 = vmatpush3.bf16.msra.mxu1 %v1199_v25 }
 0x38a   :  { %1207 = vmatprep.subr.bf16.mxu1 %v1296_v56  ;;  %v559_v31 = vadd.f32 %v558_v28, %v557_v26  ;;  %v926_v28 = vld [vmem:[%s1592_s12 + $0x38] sm:$0xff] }
 0x38b   :  { %v1267_v27 = vpop.eup %1266 }
 0x38c   :  { %v554_v29 = vmul.f32 %v1267_v27, %v1263_v14  ;;  %v560_v34 = vrot.slane %v559_v31, 1  ;;  %v919_v14 = vld [vmem:[%s1592_s12] sm:$0xff]  ;;  %v925_v27 = vld [vmem:[%s1592_s12 + $0x30] sm:$0xff]  ;;  %s1026_s12 = sshll.u32 %s1301_s3, 4  ;;  %s1027_s12 = int_to_ptr.vmem [resolvable:$true] %s1026_s12 }
 0x38d   :  { %v1214_v17 = vpack.c.bf16 %v920_v15, %v919_v14  ;;  %p1273_p1 = scmp.lt.s32.totalorder %s1027_s12, %s1027_s12 }
 0x38e   :  { %1136 = vmatmul.mubr.msk.f32.vlgmr.msra.gmra.mrb[8].mxu1 %vm577_vm7, %v554_v29  ;;  %v562_v30 = vsel %vm532_vm6, %v554_v29, 0.0  ;;  %v561_v37 = vadd.f32 %v560_v34, %v559_v31  ;;  %v1223_v29 = vpack.c.bf16 %v926_v28, %v925_v27  ;;  %v1055_v34 = vld [vmem:[%s1593_s13] ss:$0 sm:$0xff] }
 0x38f   :  { %v563_v32 = vrot.slane %v562_v30, 4  ;;  %1157 = vmatprep.mubr.msk.f32.mxu1 %vm1297_vm1, %v1298_v57  ;;  %1209 = vmatpush3.bf16.msra.mxu1 %v1208_v52 }
 0x390   :  { %v569_v40 = vmul.f32 0.25, %v561_v37  ;;  %1210 = vmatprep.subr.bf16.mxu1 %v1296_v56 }
 0x391   :  { %v564_v33 = vadd.f32 %v563_v32, %v562_v30 }
 0x393   :  { %v565_v35 = vrot.slane %v564_v33, 2 }
 0x395   :  { %v566_v36 = vadd.f32 %v565_v35, %v564_v33 }
 0x397   :  { %v567_v38 = vrot.slane %v566_v36, 1 }
 0x399   :  { %v568_v39 = vadd.f32 %v567_v38, %v566_v36 }
 0x39b   :  { %v570_v41 = vmul.f32 0.25, %v568_v39 }
 0x39d   :  { %v1012_v42 = vsel %vm760_vm8, %v570_v41, %v569_v40 }
 0x39e   :  { %1013 = vrot.lane.b32.xlu1 %v1012_v42, %s1300_s7 }
 0x410   :  { %v1014_v38 = vpop.permute.xlu1 %1013 }
 0x456   :  { %v647_v53 = vpop.f32.mrb[6].mxu1 }
 0x457   :  { %v730_v54 = vmul.f32 %v647_v53, %v1468_v43  ;;  %v1130_v55 = vpop.f32.mrb[7].mxu1 }
 0x459   :  { %v733_v58 = vsel %vm732_vm9, %v730_v54, 0.0 }
 0x45a   :  { %v734_v59 = vrot.slane %v733_v58, 4 }
 0x45c   :  { %v735_v60 = vadd.f32 %v734_v59, %v733_v58 }
 0x45e   :  { %v736_v1 = vrot.slane %v735_v60, 2 }
 0x460   :  { %v737_v3 = vadd.f32 %v736_v1, %v735_v60 }
 0x461   :  { %v726_v62 = vpop.f32.mrb[8].mxu1 }
 0x462   :  { %v731_v63 = vmul.f32 %v726_v62, %v1468_v43  ;;  %v1137_v0 = vpop.f32.mrb[9].mxu1  ;;  %v738_v6 = vrot.slane %v737_v3, 1  ;;  %v836_v43 = vld [vmem:[%s1590_s10 + $0x10] sm:$0xff] }
 0x463   :  { %v1211_v13 = vpack.c.bf16 %v837_v12, %v836_v43 }
 0x464   :  { %v740_v61 = vsel %vm732_vm9, %v731_v63, 0.0  ;;  %v739_v9 = vadd.f32 %v738_v6, %v737_v3 }
 0x465   :  { %v741_v2 = vrot.slane %v740_v61, 4  ;;  %1212 = vmatpush3.bf16.msra.mxu1 %v1211_v13 }
 0x467   :  { %v742_v4 = vadd.f32 %v741_v2, %v740_v61 }
 0x469   :  { %v743_v5 = vrot.slane %v742_v4, 2 }
 0x46b   :  { %v744_v7 = vadd.f32 %v743_v5, %v742_v4 }
 0x46d   :  { %v745_v8 = vrot.slane %v744_v7, 1 }
 0x46f   :  { %v746_v10 = vadd.f32 %v745_v8, %v744_v7 }
 0x471   :  { %v761_v11 = vsel %vm760_vm8, %v746_v10, %v739_v9 }
 0x472   :  { %1147 = vmatmul.mubr.msk.f32.vlgmr.msra.gmra.mrb[2].mxu0 %vm250_vm0, %v761_v11 }
 0x473   :  { %1176 = vmatprep.mubr.msk.f32.mxu0 %vm1297_vm1, %v1298_v57  ;;  %1215 = vmatpush3.bf16.msra.mxu0 %v1214_v17 }
 0x474   :  { %1216 = vmatprep.subr.bf16.mxu0 %v1296_v56 }
 0x477   :  { %1218 = vmatpush3.bf16.msra.mxu0 %v1217_v19 }
 0x478   :  { %1219 = vmatprep.subr.bf16.mxu0 %v1296_v56 }
 0x47b   :  { %1221 = vmatpush3.bf16.msra.mxu0 %v1220_v22 }
 0x47c   :  { %1222 = vmatprep.subr.bf16.mxu0 %v1296_v56  ;;  %v1053_v56 = vld [vmem:[%s1591_s11] ss:$0 sm:$0xff]  ;;  %s1268_s11 = scalar_lea.vmem %s1027_s12, 32 }
 0x47d   :  { %p1269_p0 = scmp.ne.s32.totalorder %s1027_s12, %s1268_s11  ;;  %p1274_p2 = scmp.lt.s32.totalorder %s1268_s11, %s1268_s11 }
 0x47f   :  { %1224 = vmatpush3.bf16.msra.mxu0 %v1223_v29  ;;  %p1275_p3 = por %p1274_p2, %p1273_p1 }
 0x481   :  { %p1276_p4 = pnand %p1275_p3, %p1269_p0 }
 0x545   :  { %v830_v24 = vpop.f32.mrb[2].mxu0 }
 0x546   :  { %v831_v25 = vadd.f32 %v1051_v23, %v830_v24  ;;  %v1148_v26 = vpop.f32.mrb[3].mxu0 }
 0x548   :  { %1158 = vmatmul.mubr.msk.f32.vlgmr.msra.gmra.mrb[10].mxu1 %vm250_vm0, %v831_v25 }
 0x61b   :  { %v914_v30 = vpop.f32.mrb[10].mxu1 }
 0x61c   :  { %v915_v31 = vadd.f32 %v1053_v56, %v914_v30  ;;  %v1159_v32 = vpop.f32.mrb[11].mxu1 }
 0x61e   :  { %v918_v33 = vmax.f32 %v915_v31, 0.0 }
 0x620   :  { %1177 = vmatmul.mubr.msk.f32.vlgmr.msra.gmra.mrb[4].mxu0 %vm934_vm10, %v918_v33 }
 0x6f3   :  { %v1004_v35 = vpop.f32.mrb[4].mxu0 }
 0x6f4   :  { %v1005_v36 = vadd.f32 %v1055_v34, %v1004_v35  ;;  %v1178_v37 = vpop.f32.mrb[5].mxu0 }
 0x6f6   :  { %1009 = vst.msk [vmem:[#allocation2] sm:$0x3] %vm1008_vm11, %v1005_v36 }
 0x6f7   :  { %1017 = vst.msk [vmem:[#allocation2] sm:$0x3] %vm1016_vm12, %v1014_v38 }
 0x6f8   :  { %1019 = vst.msk [vmem:[#allocation2] sm:$0x3] %vm1018_vm13, %v1298_v57 }
 0x6f9   :  { %1279 = shalt.err (!%p1276_p4)
}
 0x6fa   :  { %s1280_s22 = scalar_lea.hbm %s1594_s14, 32 }
 0x6fb   :  { %p1281_p5 = scmp.ne.s32.totalorder %s1594_s14, %s1280_s22  ;;  %p1284_p6 = scmp.lt.u32.totalorder %s1280_s22, %s1594_s14 }
 0x6fd   :  { %p1286_p7 = pnand %p1284_p6, %p1281_p5 }
 0x6ff   :  { %1289 = shalt.err (!%p1286_p7)
}
 0x700   :  { %1029 = dma.vmem_to_hbm [thread:$0]  %s1027_s12, 32, %s1594_s14, [#allocation3]  }
 0x701   :  { %1290 = dma.done.wait [#allocation3], 32  }
 0x702   :  { %1291 = vsyncadd [#allocation3], 4294967264 }
 0x703   :  { %1033 = vsyncpa [#allocation3], 1 }

</bundles_post_ra>
